<compile_context>
chip_gen: v7x
topology: tpu7x:2x2x1
jax: 0.10.0
libtpu: 0.0.40
codegen_flags: <defaults>
</compile_context>

<pallas_src>
import functools

import numpy as np

import jax
import jax.numpy as jnp
from jax import lax
from jax.experimental import pallas as pl
from jax.experimental.pallas import tpu as pltpu

_BN_EPS = 1e-5
_VMEM_LIMIT = 48 * 1024 * 1024


# ---------------------------------------------------------------------------
# in-kernel helpers
# ---------------------------------------------------------------------------
def _shift_lanes(x, d):
    """v[:, p] = x[:, p + d] if 0 <= p + d < L else 0  (static shift, zero fill)."""
    if d == 0:
        return x
    C, L = x.shape
    zeros = jnp.zeros((C, abs(d)), x.dtype)
    if d > 0:
        return jnp.concatenate([x[:, d:], zeros], axis=1)
    return jnp.concatenate([zeros, x[:, :L + d]], axis=1)


def _conv3x3_same(xT, w, mask_last, mask_first, width):
    """3x3 stride-1 'same' conv in channels-major layout, one MXU matmul.

    xT         : [Cin, H*W]  f32  (one image, CHW-flattened, unpadded)
    w          : [Cout, 9*Cin] bf16, w[co, (kh*3+kw)*Cin + ci] = w_oihw[co, ci, kh, kw]
    mask_last  : [1, H*W] f32, zeroes image column W-1  (border for kw=0 taps)
    mask_first : [1, H*W] f32, zeroes image column 0    (border for kw=2 taps)
    returns    : [Cout, H*W] f32 accumulator
    """
    variants = (xT * mask_last, xT, xT * mask_first)          # indexed by kw
    taps = []
    for kh in range(3):
        for kw in range(3):
            taps.append(_shift_lanes(variants[kw], (kh - 1) * width + (kw - 1)))
    rhs = jnp.concatenate(taps, axis=0).astype(jnp.bfloat16)  # [9*Cin, H*W]
    return jnp.dot(w, rhs, preferred_element_type=jnp.float32)


def _make_fused_kernel(*, H, W, Cout, stride, has_proj, batch_tile):
    del H
    Wo = W // stride

    def kernel(*refs):
        it = iter(refs)
        x_ref = next(it)                        # [Bt, Cin, H*W]   f32 (NCHW-flat)
        w1_ref = next(it)                       # [Cout, 9*Cin]    bf16
        s1_ref = next(it); b1_ref = next(it)    # [Cout, 1] f32
        w2_ref = next(it)                       # [Cout, 9*Cout]   bf16
        s2_ref = next(it); b2_ref = next(it)    # [Cout, 1] f32
        ml1_ref = next(it); mf1_ref = next(it)  # [1, H*W] f32 border masks
        if stride != 1:
            ml2_ref = next(it); mf2_ref = next(it)   # [1, Ho*Wo] f32
            sel_ref = next(it)                       # [H*W, Ho*Wo] one-hot bf16
        if has_proj:
            wr_ref = next(it)                        # [Cout, Cin] bf16
            sr_ref = next(it); br_ref = next(it)     # [Cout, 1]  f32
        o_ref = next(it)                             # [Bt, Cout, Ho*Wo] f32

        # Hoist parameter loads out of the (unrolled) batch loop.
        w1 = w1_ref[...]; w2 = w2_ref[...]
        s1 = s1_ref[...]; b1 = b1_ref[...]
        s2 = s2_ref[...]; b2 = b2_ref[...]
        ml1 = ml1_ref[...]; mf1 = mf1_ref[...]
        if stride != 1:
            ml2 = ml2_ref[...]; mf2 = mf2_ref[...]
            sel = sel_ref[...]
        else:
            ml2, mf2 = ml1, mf1
        if has_proj:
            wr = wr_ref[...]; sr = sr_ref[...]; br = br_ref[...]

        for b in range(batch_tile):                       # static unroll
            xT = x_ref[b]                                 # [Cin, H*W] f32

            # ---- conv1 + bn1 + relu (stride-1 grid, subsampled below) ----
            a1 = _conv3x3_same(xT, w1, ml1, mf1, W)
            y1 = jnp.maximum(a1 * s1 + b1, 0.0)           # [Cout, H*W] f32

            # ---- residual branch (stays in VMEM, no HBM round trip) ----
            if has_proj:
                xb = xT.astype(jnp.bfloat16)
                if stride != 1:
                    # Subsample the input first (exact bf16 one-hot selection),
                    # then run the 1x1 projection at the reduced resolution.
                    xb = jnp.dot(xb, sel,
                                 preferred_element_type=jnp.float32
                                 ).astype(jnp.bfloat16)   # [Cin, Ho*Wo]
                res = jnp.dot(wr, xb, preferred_element_type=jnp.float32)
                res = res * sr + br                       # [Cout, Ho*Wo] f32
            else:
                res = xT                                  # identity (Cin==Cout, s==1)

            # ---- stride != 1: subsample conv1 output (bf16 one-hot matmul) ----
            # TODO(synk): conv1 above still does stride-1 work; a direct strided
            # im2col would avoid the extra MACs for downsample blocks.
            if stride != 1:
                y1 = jnp.dot(y1.astype(jnp.bfloat16), sel,
                             preferred_element_type=jnp.float32)   # [Cout, Ho*Wo]

            # ---- conv2 + bn2 + add + relu ----
            a2 = _conv3x3_same(y1, w2, ml2, mf2, Wo)
            y2 = jnp.maximum(a2 * s2 + b2 + res, 0.0)                  # [Cout, Ho*Wo]

            # ---- lane-dense NCHW store (last dim = Ho*Wo) ----
            o_ref[b] = y2.astype(o_ref.dtype)

    return kernel


# ---------------------------------------------------------------------------
# wrapper
# ---------------------------------------------------------------------------
def _bn_affine(bn, cout):
    scale = bn["gamma"] * lax.rsqrt(bn["var"] + _BN_EPS)
    shift = bn["beta"] - bn["mean"] * scale
    return (scale.reshape(cout, 1).astype(jnp.float32),
            shift.reshape(cout, 1).astype(jnp.float32))


def _border_masks(height, width):
    col = np.arange(height * width) % width
    m_last = (col != width - 1).astype(np.float32).reshape(1, -1)
    m_first = (col != 0).astype(np.float32).reshape(1, -1)
    return jnp.asarray(m_last), jnp.asarray(m_first)


def _subsample_onehot(H, W, stride):
    Ho, Wo = H // stride, W // stride
    out_idx = np.arange(Ho * Wo)
    src_idx = (out_idx // Wo) * (stride * W) + (out_idx % Wo) * stride
    sel = np.zeros((H * W, Ho * Wo), np.float32)
    sel[src_idx, out_idx] = 1.0
    return jnp.asarray(sel).astype(jnp.bfloat16)   # one-hot: exact in bf16


def _pack_conv3x3(w_oihw, cout, cin):
    # OIHW -> [Cout, (kh*3 + kw)*Cin + ci], bf16 for the MXU.
    return (jnp.transpose(w_oihw, (0, 2, 3, 1))       # (Cout, 3, 3, Cin)
            .reshape(cout, 9 * cin).astype(jnp.bfloat16))


@functools.partial(jax.jit, static_argnames=("stride", "batch_tile"))
def basic_block_forward(x_nchw, params, stride=1, batch_tile=None):
    N, Cin, H, W = x_nchw.shape
    Cout = params["conv1_w"].shape[0]
    Ho, Wo = H // stride, W // stride
    L1, L2 = H * W, Ho * Wo
    has_proj = (stride != 1) or (Cin != Cout)

    # Batch tile: amortize per-grid-step overhead; keep grid >= 2 for 2-TC chips.
    bt = batch_tile if batch_tile is not None else (2 if N >= 4 else 1)
    while N % bt:
        bt -= 1

    # NCHW -> [N, Cin, H*W]: a free reshape -- no wrapper-side HBM pass at all.
    x = x_nchw.reshape(N, Cin, L1).astype(jnp.float32)

    w1 = _pack_conv3x3(params["conv1_w"], Cout, Cin)
    w2 = _pack_conv3x3(params["conv2_w"], Cout, Cout)
    s1, b1 = _bn_affine(params["bn1"], Cout)
    s2, b2 = _bn_affine(params["bn2"], Cout)
    ml1, mf1 = _border_masks(H, W)

    args = [x, w1, s1, b1, w2, s2, b2, ml1, mf1]
    in_specs = [
        pl.BlockSpec((bt, Cin, L1), lambda n: (n, 0, 0)),
        pl.BlockSpec((Cout, 9 * Cin), lambda n: (0, 0)),
        pl.BlockSpec((Cout, 1), lambda n: (0, 0)),
        pl.BlockSpec((Cout, 1), lambda n: (0, 0)),
        pl.BlockSpec((Cout, 9 * Cout), lambda n: (0, 0)),
        pl.BlockSpec((Cout, 1), lambda n: (0, 0)),
        pl.BlockSpec((Cout, 1), lambda n: (0, 0)),
        pl.BlockSpec((1, L1), lambda n: (0, 0)),
        pl.BlockSpec((1, L1), lambda n: (0, 0)),
    ]
    if stride != 1:
        ml2, mf2 = _border_masks(Ho, Wo)
        sel = _subsample_onehot(H, W, stride)                 # [L1, L2] bf16
        args += [ml2, mf2, sel]
        in_specs += [
            pl.BlockSpec((1, L2), lambda n: (0, 0)),
            pl.BlockSpec((1, L2), lambda n: (0, 0)),
            pl.BlockSpec((L1, L2), lambda n: (0, 0)),
        ]
    if has_proj:
        wr = params["convr_w"][:, :, 0, 0].astype(jnp.bfloat16)   # [Cout, Cin]
        sr, br = _bn_affine(params["bnr"], Cout)
        args += [wr, sr, br]
        in_specs += [
            pl.BlockSpec((Cout, Cin), lambda n: (0, 0)),
            pl.BlockSpec((Cout, 1), lambda n: (0, 0)),
            pl.BlockSpec((Cout, 1), lambda n: (0, 0)),
        ]

    kernel = _make_fused_kernel(H=H, W=W, Cout=Cout, stride=stride,
                                has_proj=has_proj, batch_tile=bt)
    out = pl.pallas_call(
        kernel,
        out_shape=jax.ShapeDtypeStruct((N, Cout, L2), jnp.float32),
        grid=(N // bt,),
        in_specs=in_specs,
        out_specs=pl.BlockSpec((bt, Cout, L2), lambda n: (n, 0, 0)),
        compiler_params=pltpu.CompilerParams(
            dimension_semantics=("parallel",),
            vmem_limit_bytes=_VMEM_LIMIT),
    )(*args)
    return out.reshape(N, Cout, Ho, Wo)   # free reshape -> NCHW


# ---------------------------------------------------------------------------
# pure-JAX reference (f32) and deterministic parameter init
# ---------------------------------------------------------------------------
def basic_block_reference(x, params, stride=1):
    def conv(x, w, s, pad):
        return lax.conv_general_dilated(
            x, w, (s, s), ((pad, pad), (pad, pad)),
            dimension_numbers=("NCHW", "OIHW", "NCHW"))

    def bn(x, p):
        sc = p["gamma"] / jnp.sqrt(p["var"] + _BN_EPS)
        sh = p["beta"] - p["mean"] * sc
        return x * sc[None, :, None, None] + sh[None, :, None, None]

    identity = x
    h = jax.nn.relu(bn(conv(x, params["conv1_w"], stride, 1), params["bn1"]))
    h = bn(conv(h, params["conv2_w"], 1, 1), params["bn2"])
    if stride != 1 or x.shape[1] != params["conv1_w"].shape[0]:
        res = bn(conv(identity, params["convr_w"], stride, 0), params["bnr"])
    else:
        res = identity
    return jax.nn.relu(h + res)


def init_params(key, in_channels, out_channels):
    ks = jax.random.split(key, 6)

    def bn_params(k, c):
        k1, k2, k3, k4 = jax.random.split(k, 4)
        return dict(
            gamma=jax.random.uniform(k1, (c,), jnp.float32, 0.5, 1.5),
            beta=0.1 * jax.random.normal(k2, (c,), jnp.float32),
            mean=0.1 * jax.random.normal(k3, (c,), jnp.float32),
            var=jax.random.uniform(k4, (c,), jnp.float32, 0.5, 1.5),
        )

    return dict(
        conv1_w=0.1 * jax.random.normal(ks[0], (out_channels, in_channels, 3, 3), jnp.float32),
        conv2_w=0.1 * jax.random.normal(ks[1], (out_channels, out_channels, 3, 3), jnp.float32),
        convr_w=0.1 * jax.random.normal(ks[2], (out_channels, in_channels, 1, 1), jnp.float32),
        bn1=bn_params(ks[3], out_channels),
        bn2=bn_params(ks[4], out_channels),
        bnr=bn_params(ks[5], out_channels),
    )


# ---------------------------------------------------------------------------
if __name__ == "__main__":
    key = jax.random.PRNGKey(0)
    kx, kp = jax.random.split(key)

    H = W = 16
    cases = [
        dict(N=2, Cin=4, Cout=8, stride=1, batch_tile=None),  # projection residual
        dict(N=2, Cin=4, Cout=8, stride=2, batch_tile=None),  # downsample + projection
        dict(N=2, Cin=8, Cout=8, stride=1, batch_tile=None),  # identity residual
        dict(N=4, Cin=4, Cout=8, stride=1, batch_tile=2),     # batch-tiled grid
    ]

    ok = True
    for idx, c in enumerate(cases):
        kxi = jax.random.fold_in(kx, idx)
        kpi = jax.random.fold_in(kp, idx)
        x = jax.random.normal(kxi, (c["N"], c["Cin"], H, W), jnp.float32)
        params = init_params(kpi, c["Cin"], c["Cout"])

        y = jax.block_until_ready(
            basic_block_forward(x, params, stride=c["stride"],
                                batch_tile=c["batch_tile"]))
        y_ref = basic_block_reference(x, params, stride=c["stride"])

        # bf16 MXU operands vs f32 reference -> loose tolerance; real structural
        # bugs produce O(0.1-1) errors and are still caught.
        good = (y.shape == y_ref.shape) and bool(
            jnp.allclose(y, y_ref, rtol=5e-2, atol=5e-2))
        if not good:
            ok = False
            err = (float(jnp.max(jnp.abs(y - y_ref)))
                   if y.shape == y_ref.shape else float("nan"))
            print(f"MISMATCH case={c}: shapes {y.shape} vs {y_ref.shape}, "
                  f"max abs err = {err}")

    if ok:
        print("KERNEL_OK")
</pallas_src>

<mosaic_0001>
module attributes {stable_mosaic.version = 11 : i64} {
  func.func @kernel(%arg0: i32, %arg1: memref<1x4x256xf32, #tpu.memory_space<vmem>>, %arg2: memref<8x36xbf16, #tpu.memory_space<vmem>>, %arg3: memref<8x1xf32, #tpu.memory_space<vmem>>, %arg4: memref<8x1xf32, #tpu.memory_space<vmem>>, %arg5: memref<8x72xbf16, #tpu.memory_space<vmem>>, %arg6: memref<8x1xf32, #tpu.memory_space<vmem>>, %arg7: memref<8x1xf32, #tpu.memory_space<vmem>>, %arg8: memref<1x256xf32, #tpu.memory_space<vmem>>, %arg9: memref<1x256xf32, #tpu.memory_space<vmem>>, %arg10: memref<8x4xbf16, #tpu.memory_space<vmem>>, %arg11: memref<8x1xf32, #tpu.memory_space<vmem>>, %arg12: memref<8x1xf32, #tpu.memory_space<vmem>>, %arg13: memref<1x8x256xf32, #tpu.memory_space<vmem>>) attributes {dimension_semantics = [#tpu.dimension_semantics<parallel>], iteration_bounds = array<i64: 2>, scalar_prefetch = 0 : i64, scratch_operands = 0 : i64, tpu.core_type = #tpu.core_type<tc>, window_params = [{transform_indices = @transform_0, window_bounds = array<i64: 1, 4, 256>}, {pipeline_mode = #tpu.pipeline_mode<synchronous>, transform_indices = @transform_1, window_bounds = array<i64: 8, 36>}, {pipeline_mode = #tpu.pipeline_mode<synchronous>, transform_indices = @transform_2, window_bounds = array<i64: 8, 1>}, {pipeline_mode = #tpu.pipeline_mode<synchronous>, transform_indices = @transform_3, window_bounds = array<i64: 8, 1>}, {pipeline_mode = #tpu.pipeline_mode<synchronous>, transform_indices = @transform_4, window_bounds = array<i64: 8, 72>}, {pipeline_mode = #tpu.pipeline_mode<synchronous>, transform_indices = @transform_5, window_bounds = array<i64: 8, 1>}, {pipeline_mode = #tpu.pipeline_mode<synchronous>, transform_indices = @transform_6, window_bounds = array<i64: 8, 1>}, {pipeline_mode = #tpu.pipeline_mode<synchronous>, transform_indices = @transform_7, window_bounds = array<i64: 1, 256>}, {pipeline_mode = #tpu.pipeline_mode<synchronous>, transform_indices = @transform_8, window_bounds = array<i64: 1, 256>}, {pipeline_mode = #tpu.pipeline_mode<synchronous>, transform_indices = @transform_9, window_bounds = array<i64: 8, 4>}, {pipeline_mode = #tpu.pipeline_mode<synchronous>, transform_indices = @transform_10, window_bounds = array<i64: 8, 1>}, {pipeline_mode = #tpu.pipeline_mode<synchronous>, transform_indices = @transform_11, window_bounds = array<i64: 8, 1>}, {transform_indices = @transform_12, window_bounds = array<i64: 1, 8, 256>}]} {
    %c0 = arith.constant 0 : index
    %c0_0 = arith.constant 0 : index
    %0 = vector.load %arg2[%c0, %c0_0] : memref<8x36xbf16, #tpu.memory_space<vmem>>, vector<8x36xbf16>
    %c0_1 = arith.constant 0 : index
    %c0_2 = arith.constant 0 : index
    %1 = vector.load %arg5[%c0_1, %c0_2] : memref<8x72xbf16, #tpu.memory_space<vmem>>, vector<8x72xbf16>
    %c0_3 = arith.constant 0 : index
    %c0_4 = arith.constant 0 : index
    %2 = vector.load %arg3[%c0_3, %c0_4] : memref<8x1xf32, #tpu.memory_space<vmem>>, vector<8x1xf32>
    %c0_5 = arith.constant 0 : index
    %c0_6 = arith.constant 0 : index
    %3 = vector.load %arg4[%c0_5, %c0_6] : memref<8x1xf32, #tpu.memory_space<vmem>>, vector<8x1xf32>
    %c0_7 = arith.constant 0 : index
    %c0_8 = arith.constant 0 : index
    %4 = vector.load %arg6[%c0_7, %c0_8] : memref<8x1xf32, #tpu.memory_space<vmem>>, vector<8x1xf32>
    %c0_9 = arith.constant 0 : index
    %c0_10 = arith.constant 0 : index
    %5 = vector.load %arg7[%c0_9, %c0_10] : memref<8x1xf32, #tpu.memory_space<vmem>>, vector<8x1xf32>
    %c0_11 = arith.constant 0 : index
    %c0_12 = arith.constant 0 : index
    %6 = vector.load %arg8[%c0_11, %c0_12] : memref<1x256xf32, #tpu.memory_space<vmem>>, vector<1x256xf32>
    %c0_13 = arith.constant 0 : index
    %c0_14 = arith.constant 0 : index
    %7 = vector.load %arg9[%c0_13, %c0_14] : memref<1x256xf32, #tpu.memory_space<vmem>>, vector<1x256xf32>
    %c0_15 = arith.constant 0 : index
    %c0_16 = arith.constant 0 : index
    %8 = vector.load %arg10[%c0_15, %c0_16] : memref<8x4xbf16, #tpu.memory_space<vmem>>, vector<8x4xbf16>
    %c0_17 = arith.constant 0 : index
    %c0_18 = arith.constant 0 : index
    %9 = vector.load %arg11[%c0_17, %c0_18] : memref<8x1xf32, #tpu.memory_space<vmem>>, vector<8x1xf32>
    %c0_19 = arith.constant 0 : index
    %c0_20 = arith.constant 0 : index
    %10 = vector.load %arg12[%c0_19, %c0_20] : memref<8x1xf32, #tpu.memory_space<vmem>>, vector<8x1xf32>
    %c0_21 = arith.constant 0 : index
    %c0_22 = arith.constant 0 : index
    %c0_23 = arith.constant 0 : index
    %11 = vector.load %arg1[%c0_21, %c0_22, %c0_23] : memref<1x4x256xf32, #tpu.memory_space<vmem>>, vector<1x4x256xf32>
    %12 = vector.shape_cast %11 : vector<1x4x256xf32> to vector<4x256xf32>
    %13 = vector.broadcast %6 : vector<1x256xf32> to vector<4x256xf32>
    %14 = arith.mulf %12, %13 : vector<4x256xf32>
    %15 = vector.broadcast %7 : vector<1x256xf32> to vector<4x256xf32>
    %16 = arith.mulf %12, %15 : vector<4x256xf32>
    %cst = arith.constant 0.000000e+00 : f32
    %17 = vector.broadcast %cst : f32 to vector<4x17xf32>
    %18 = vector.extract_strided_slice %14 {offsets = [0, 0], sizes = [4, 239], strides = [1, 1]} : vector<4x256xf32> to vector<4x239xf32>
    %19 = tpu.concatenate %17, %18 in 1 : vector<4x17xf32>, vector<4x239xf32> -> vector<4x256xf32>
    %cst_24 = arith.constant 0.000000e+00 : f32
    %20 = vector.broadcast %cst_24 : f32 to vector<4x16xf32>
    %21 = vector.extract_strided_slice %12 {offsets = [0, 0], sizes = [4, 240], strides = [1, 1]} : vector<4x256xf32> to vector<4x240xf32>
    %22 = tpu.concatenate %20, %21 in 1 : vector<4x16xf32>, vector<4x240xf32> -> vector<4x256xf32>
    %cst_25 = arith.constant 0.000000e+00 : f32
    %23 = vector.broadcast %cst_25 : f32 to vector<4x15xf32>
    %24 = vector.extract_strided_slice %16 {offsets = [0, 0], sizes = [4, 241], strides = [1, 1]} : vector<4x256xf32> to vector<4x241xf32>
    %25 = tpu.concatenate %23, %24 in 1 : vector<4x15xf32>, vector<4x241xf32> -> vector<4x256xf32>
    %cst_26 = arith.constant 0.000000e+00 : f32
    %26 = vector.broadcast %cst_26 : f32 to vector<4x1xf32>
    %27 = vector.extract_strided_slice %14 {offsets = [0, 0], sizes = [4, 255], strides = [1, 1]} : vector<4x256xf32> to vector<4x255xf32>
    %28 = tpu.concatenate %26, %27 in 1 : vector<4x1xf32>, vector<4x255xf32> -> vector<4x256xf32>
    %cst_27 = arith.constant 0.000000e+00 : f32
    %29 = vector.broadcast %cst_27 : f32 to vector<4x1xf32>
    %30 = vector.extract_strided_slice %16 {offsets = [0, 1], sizes = [4, 255], strides = [1, 1]} : vector<4x256xf32> to vector<4x255xf32>
    %31 = tpu.concatenate %30, %29 in 1 : vector<4x255xf32>, vector<4x1xf32> -> vector<4x256xf32>
    %cst_28 = arith.constant 0.000000e+00 : f32
    %32 = vector.broadcast %cst_28 : f32 to vector<4x15xf32>
    %33 = vector.extract_strided_slice %14 {offsets = [0, 15], sizes = [4, 241], strides = [1, 1]} : vector<4x256xf32> to vector<4x241xf32>
    %34 = tpu.concatenate %33, %32 in 1 : vector<4x241xf32>, vector<4x15xf32> -> vector<4x256xf32>
    %cst_29 = arith.constant 0.000000e+00 : f32
    %35 = vector.broadcast %cst_29 : f32 to vector<4x16xf32>
    %36 = vector.extract_strided_slice %12 {offsets = [0, 16], sizes = [4, 240], strides = [1, 1]} : vector<4x256xf32> to vector<4x240xf32>
    %37 = tpu.concatenate %36, %35 in 1 : vector<4x240xf32>, vector<4x16xf32> -> vector<4x256xf32>
    %cst_30 = arith.constant 0.000000e+00 : f32
    %38 = vector.broadcast %cst_30 : f32 to vector<4x17xf32>
    %39 = vector.extract_strided_slice %16 {offsets = [0, 17], sizes = [4, 239], strides = [1, 1]} : vector<4x256xf32> to vector<4x239xf32>
    %40 = tpu.concatenate %39, %38 in 1 : vector<4x239xf32>, vector<4x17xf32> -> vector<4x256xf32>
    %41 = tpu.concatenate %19, %22, %25, %28, %12, %31, %34, %37, %40 in 0 : vector<4x256xf32>, vector<4x256xf32>, vector<4x256xf32>, vector<4x256xf32>, vector<4x256xf32>, vector<4x256xf32>, vector<4x256xf32>, vector<4x256xf32>, vector<4x256xf32> -> vector<36x256xf32>
    %42 = arith.truncf %41 : vector<36x256xf32> to vector<36x256xbf16>
    %cst_31 = arith.constant dense<0.000000e+00> : vector<8x256xf32>
    %43 = tpu.matmul %0, %42, %cst_31 {dimension_numbers = #tpu.dot_dimension_numbers<[1], [0], [0], [1], [0, 0, 1, 1], [], []>} : vector<8x36xbf16>, vector<36x256xbf16>, vector<8x256xf32> -> vector<8x256xf32>
    %44 = vector.broadcast %2 : vector<8x1xf32> to vector<8x256xf32>
    %45 = arith.mulf %43, %44 : vector<8x256xf32>
    %46 = vector.broadcast %3 : vector<8x1xf32> to vector<8x256xf32>
    %47 = arith.addf %45, %46 : vector<8x256xf32>
    %cst_32 = arith.constant 0.000000e+00 : f32
    %48 = vector.broadcast %cst_32 : f32 to vector<8x256xf32>
    %49 = arith.maximumf %47, %48 : vector<8x256xf32>
    %50 = arith.truncf %12 : vector<4x256xf32> to vector<4x256xbf16>
    %cst_33 = arith.constant dense<0.000000e+00> : vector<8x256xf32>
    %51 = tpu.matmul %8, %50, %cst_33 {dimension_numbers = #tpu.dot_dimension_numbers<[1], [0], [0], [1], [0, 0, 1, 1], [], []>} : vector<8x4xbf16>, vector<4x256xbf16>, vector<8x256xf32> -> vector<8x256xf32>
    %52 = vector.broadcast %9 : vector<8x1xf32> to vector<8x256xf32>
    %53 = arith.mulf %51, %52 : vector<8x256xf32>
    %54 = vector.broadcast %10 : vector<8x1xf32> to vector<8x256xf32>
    %55 = arith.addf %53, %54 : vector<8x256xf32>
    %56 = vector.broadcast %6 : vector<1x256xf32> to vector<8x256xf32>
    %57 = arith.mulf %49, %56 : vector<8x256xf32>
    %58 = vector.broadcast %7 : vector<1x256xf32> to vector<8x256xf32>
    %59 = arith.mulf %49, %58 : vector<8x256xf32>
    %cst_34 = arith.constant 0.000000e+00 : f32
    %60 = vector.broadcast %cst_34 : f32 to vector<8x17xf32>
    %61 = vector.extract_strided_slice %57 {offsets = [0, 0], sizes = [8, 239], strides = [1, 1]} : vector<8x256xf32> to vector<8x239xf32>
    %62 = tpu.concatenate %60, %61 in 1 : vector<8x17xf32>, vector<8x239xf32> -> vector<8x256xf32>
    %cst_35 = arith.constant 0.000000e+00 : f32
    %63 = vector.broadcast %cst_35 : f32 to vector<8x16xf32>
    %64 = vector.extract_strided_slice %49 {offsets = [0, 0], sizes = [8, 240], strides = [1, 1]} : vector<8x256xf32> to vector<8x240xf32>
    %65 = tpu.concatenate %63, %64 in 1 : vector<8x16xf32>, vector<8x240xf32> -> vector<8x256xf32>
    %cst_36 = arith.constant 0.000000e+00 : f32
    %66 = vector.broadcast %cst_36 : f32 to vector<8x15xf32>
    %67 = vector.extract_strided_slice %59 {offsets = [0, 0], sizes = [8, 241], strides = [1, 1]} : vector<8x256xf32> to vector<8x241xf32>
    %68 = tpu.concatenate %66, %67 in 1 : vector<8x15xf32>, vector<8x241xf32> -> vector<8x256xf32>
    %cst_37 = arith.constant 0.000000e+00 : f32
    %69 = vector.broadcast %cst_37 : f32 to vector<8x1xf32>
    %70 = vector.extract_strided_slice %57 {offsets = [0, 0], sizes = [8, 255], strides = [1, 1]} : vector<8x256xf32> to vector<8x255xf32>
    %71 = tpu.concatenate %69, %70 in 1 : vector<8x1xf32>, vector<8x255xf32> -> vector<8x256xf32>
    %cst_38 = arith.constant 0.000000e+00 : f32
    %72 = vector.broadcast %cst_38 : f32 to vector<8x1xf32>
    %73 = vector.extract_strided_slice %59 {offsets = [0, 1], sizes = [8, 255], strides = [1, 1]} : vector<8x256xf32> to vector<8x255xf32>
    %74 = tpu.concatenate %73, %72 in 1 : vector<8x255xf32>, vector<8x1xf32> -> vector<8x256xf32>
    %cst_39 = arith.constant 0.000000e+00 : f32
    %75 = vector.broadcast %cst_39 : f32 to vector<8x15xf32>
    %76 = vector.extract_strided_slice %57 {offsets = [0, 15], sizes = [8, 241], strides = [1, 1]} : vector<8x256xf32> to vector<8x241xf32>
    %77 = tpu.concatenate %76, %75 in 1 : vector<8x241xf32>, vector<8x15xf32> -> vector<8x256xf32>
    %cst_40 = arith.constant 0.000000e+00 : f32
    %78 = vector.broadcast %cst_40 : f32 to vector<8x16xf32>
    %79 = vector.extract_strided_slice %49 {offsets = [0, 16], sizes = [8, 240], strides = [1, 1]} : vector<8x256xf32> to vector<8x240xf32>
    %80 = tpu.concatenate %79, %78 in 1 : vector<8x240xf32>, vector<8x16xf32> -> vector<8x256xf32>
    %cst_41 = arith.constant 0.000000e+00 : f32
    %81 = vector.broadcast %cst_41 : f32 to vector<8x17xf32>
    %82 = vector.extract_strided_slice %59 {offsets = [0, 17], sizes = [8, 239], strides = [1, 1]} : vector<8x256xf32> to vector<8x239xf32>
    %83 = tpu.concatenate %82, %81 in 1 : vector<8x239xf32>, vector<8x17xf32> -> vector<8x256xf32>
    %84 = tpu.concatenate %62, %65, %68, %71, %49, %74, %77, %80, %83 in 0 : vector<8x256xf32>, vector<8x256xf32>, vector<8x256xf32>, vector<8x256xf32>, vector<8x256xf32>, vector<8x256xf32>, vector<8x256xf32>, vector<8x256xf32>, vector<8x256xf32> -> vector<72x256xf32>
    %85 = arith.truncf %84 : vector<72x256xf32> to vector<72x256xbf16>
    %cst_42 = arith.constant dense<0.000000e+00> : vector<8x256xf32>
    %86 = tpu.matmul %1, %85, %cst_42 {dimension_numbers = #tpu.dot_dimension_numbers<[1], [0], [0], [1], [0, 0, 1, 1], [], []>} : vector<8x72xbf16>, vector<72x256xbf16>, vector<8x256xf32> -> vector<8x256xf32>
    %87 = vector.broadcast %4 : vector<8x1xf32> to vector<8x256xf32>
    %88 = arith.mulf %86, %87 : vector<8x256xf32>
    %89 = vector.broadcast %5 : vector<8x1xf32> to vector<8x256xf32>
    %90 = arith.addf %88, %89 : vector<8x256xf32>
    %91 = arith.addf %90, %55 : vector<8x256xf32>
    %cst_43 = arith.constant 0.000000e+00 : f32
    %92 = vector.broadcast %cst_43 : f32 to vector<8x256xf32>
    %93 = arith.maximumf %91, %92 : vector<8x256xf32>
    %c0_44 = arith.constant 0 : index
    %c0_45 = arith.constant 0 : index
    %c0_46 = arith.constant 0 : index
    %94 = vector.load %arg13[%c0_44, %c0_45, %c0_46] : memref<1x8x256xf32, #tpu.memory_space<vmem>>, vector<1x8x256xf32>
    %95 = vector.shape_cast %94 : vector<1x8x256xf32> to vector<8x256xf32>
    %96 = vector.shape_cast %93 : vector<8x256xf32> to vector<1x8x256xf32>
    tpu.vector_store %arg13[%c0_44, %c0_45, %c0_46], %96 {strides = array<i32>} : memref<1x8x256xf32, #tpu.memory_space<vmem>>, vector<1x8x256xf32>,
    return
  }
  func.func @transform_0(%arg0: i32) -> (i32, i32, i32) {
    %c0_i32 = arith.constant 0 : i32
    %c0_i32_0 = arith.constant 0 : i32
    %c0_i32_1 = arith.constant 0 : i32
    return %arg0, %c0_i32, %c0_i32_0 : i32, i32, i32
  }
  func.func @transform_1(%arg0: i32) -> (i32, i32) {
    %c0_i32 = arith.constant 0 : i32
    %c0_i32_0 = arith.constant 0 : i32
    %c0_i32_1 = arith.constant 0 : i32
    return %c0_i32, %c0_i32_0 : i32, i32
  }
  func.func @transform_2(%arg0: i32) -> (i32, i32) {
    %c0_i32 = arith.constant 0 : i32
    %c0_i32_0 = arith.constant 0 : i32
    %c0_i32_1 = arith.constant 0 : i32
    return %c0_i32, %c0_i32_0 : i32, i32
  }
  func.func @transform_3(%arg0: i32) -> (i32, i32) {
    %c0_i32 = arith.constant 0 : i32
    %c0_i32_0 = arith.constant 0 : i32
    %c0_i32_1 = arith.constant 0 : i32
    return %c0_i32, %c0_i32_0 : i32, i32
  }
  func.func @transform_4(%arg0: i32) -> (i32, i32) {
    %c0_i32 = arith.constant 0 : i32
    %c0_i32_0 = arith.constant 0 : i32
    %c0_i32_1 = arith.constant 0 : i32
    return %c0_i32, %c0_i32_0 : i32, i32
  }
  func.func @transform_5(%arg0: i32) -> (i32, i32) {
    %c0_i32 = arith.constant 0 : i32
    %c0_i32_0 = arith.constant 0 : i32
    %c0_i32_1 = arith.constant 0 : i32
    return %c0_i32, %c0_i32_0 : i32, i32
  }
  func.func @transform_6(%arg0: i32) -> (i32, i32) {
    %c0_i32 = arith.constant 0 : i32
    %c0_i32_0 = arith.constant 0 : i32
    %c0_i32_1 = arith.constant 0 : i32
    return %c0_i32, %c0_i32_0 : i32, i32
  }
  func.func @transform_7(%arg0: i32) -> (i32, i32) {
    %c0_i32 = arith.constant 0 : i32
    %c0_i32_0 = arith.constant 0 : i32
    %c0_i32_1 = arith.constant 0 : i32
    return %c0_i32, %c0_i32_0 : i32, i32
  }
  func.func @transform_8(%arg0: i32) -> (i32, i32) {
    %c0_i32 = arith.constant 0 : i32
    %c0_i32_0 = arith.constant 0 : i32
    %c0_i32_1 = arith.constant 0 : i32
    return %c0_i32, %c0_i32_0 : i32, i32
  }
  func.func @transform_9(%arg0: i32) -> (i32, i32) {
    %c0_i32 = arith.constant 0 : i32
    %c0_i32_0 = arith.constant 0 : i32
    %c0_i32_1 = arith.constant 0 : i32
    return %c0_i32, %c0_i32_0 : i32, i32
  }
  func.func @transform_10(%arg0: i32) -> (i32, i32) {
    %c0_i32 = arith.constant 0 : i32
    %c0_i32_0 = arith.constant 0 : i32
    %c0_i32_1 = arith.constant 0 : i32
    return %c0_i32, %c0_i32_0 : i32, i32
  }
  func.func @transform_11(%arg0: i32) -> (i32, i32) {
    %c0_i32 = arith.constant 0 : i32
    %c0_i32_0 = arith.constant 0 : i32
    %c0_i32_1 = arith.constant 0 : i32
    return %c0_i32, %c0_i32_0 : i32, i32
  }
  func.func @transform_12(%arg0: i32) -> (i32, i32, i32) {
    %c0_i32 = arith.constant 0 : i32
    %c0_i32_0 = arith.constant 0 : i32
    %c0_i32_1 = arith.constant 0 : i32
    return %arg0, %c0_i32, %c0_i32_0 : i32, i32, i32
  }
}

</mosaic_0001>

<bundles_post_ra>
// kernel: basic_block_forward.1
= control target key start
LH: loop header
LB: loop body
LE: loop exit
PB: predicated region body
PF: predicated region fallthrough
CT: control target
= control target key end

     0   :  { %s1129_s21 = smov 0   ;;  %s1322_s0 = inlined_call_operand.vmem [shape: f32[2,4,256], index: 0, kind: input, shape index: {}]   ;;  %s1323_s1 = inlined_call_operand.vmem [shape: bf16[8,36], index: 1, kind: input, shape index: {}]   ;;  %s1324_s2 = inlined_call_operand.vmem [shape: f32[8,1], index: 2, kind: input, shape index: {}]   ;;  %s1325_s3 = inlined_call_operand.vmem [shape: f32[8,1], index: 3, kind: input, shape index: {}]   ;;  %s1326_s4 = inlined_call_operand.vmem [shape: bf16[8,72], index: 4, kind: input, shape index: {}]   ;;  %s1327_s5 = inlined_call_operand.vmem [shape: f32[8,1], index: 5, kind: input, shape index: {}]   ;;  %s1328_s6 = inlined_call_operand.vmem [shape: f32[8,1], index: 6, kind: input, shape index: {}]   ;;  %s1329_s7 = inlined_call_operand.vmem [shape: f32[1,256], index: 7, kind: input, shape index: {}]   ;;  %s1330_s8 = inlined_call_operand.vmem [shape: f32[1,256], index: 8, kind: input, shape index: {}]   ;;  %s1331_s9 = inlined_call_operand.vmem [shape: bf16[8,4], index: 9, kind: input, shape index: {}]   ;;  %s1332_s10 = inlined_call_operand.vmem [shape: f32[8,1], index: 10, kind: input, shape index: {}]   ;;  %s1333_s11 = inlined_call_operand.vmem [shape: f32[8,1], index: 11, kind: input, shape index: {}]   ;;  %s1334_s12 = inlined_call_operand.vmem [shape: f32[2,8,256], index: 12, kind: output, shape index: {}]  }
   0x1 LB: > { %s910_s22 = sadd.s32 4294967295, %s1052_s21   ;;  %p914_p0 = scmp.ge.s32.totalorder %s1052_s21, 1  ;;  %s1052_s21 = sphi %s1129_s21, %s22_s21  }
   0x2   : > { %p362_p1 = scmp.lt.s32.totalorder %s1052_s21, 3 }
   0x4   : > { %p363_p2 = pnand %p914_p0, %p362_p1 }
   0x5   : > { %p404_p3 = scmp.lt.s32.totalorder (!%p363_p2), %s910_s22, 1  ;;  %v428_v0 = vlaneseq (!%p363_p2)  ;;  %v421_v2 = vld [vmem:[%s1329_s7] sm:$0x3] (!%p363_p2)  ;;  %s1054_s13 = smov (!%p363_p2), 16   ;;  %v1061_v24 = vmov (!%p363_p2), 0   ;;  %vm468_vm0 = vcmask (!%p363_p2), 130048  }
   0x6   : > { %366 = sbr.rel (%p363_p2) target bundleno = 747 (0x2eb), region = 68  ;;  %v422_v3 = vld [vmem:[%s1330_s8] sm:$0x3] (!%p363_p2)  ;;  %s1055_s14 = smov (!%p363_p2), 17   ;;  %604 = vmatprep.mubr.bf16.mxu0 (!%p363_p2), %v1061_v24  ;;  %1003 = vset.pattern.permute.xlu0 (!%p363_p2), %v1061_v24  ;;  %vm457_vm1 = vcmask (!%p363_p2), 138240   ;;  %vm487_vm2 = vcmask (!%p363_p2), 7168   ;;  %vm1267_vm12 = vmneg (!%p363_p2), %vm468_vm0 }
   0x7   : > { %v429_v1 = vshrl.u32 (!%p363_p2), %v428_v0, 7  ;;  %s1056_s15 = smov (!%p363_p2), 1   ;;  %s1057_s16 = smov (!%p363_p2), 15   ;;  %1004 = vset.pattern.permute.xlu1 (!%p363_p2), %v1061_v24  ;;  %826 = vmatprep.mubr.bf16.mxu1 (!%p363_p2), %v1061_v24  ;;  %v417_v25 = vld [vmem:[%s1324_s2] sm:$0xff] (!%p363_p2)  ;;  %vm478_vm3 = vcmask (!%p363_p2), 121856   ;;  %vm495_vm4 = vcmask (!%p363_p2), 1039360   ;;  %vm1272_vm13 = vmneg (!%p363_p2), %vm457_vm1 }
   0x8   : > { %s1058_s17 = smov (!%p363_p2), 127   ;;  %s1059_s18 = smov (!%p363_p2), 112   ;;  %v418_v26 = vld [vmem:[%s1325_s3] sm:$0xff] (!%p363_p2)  ;;  %vm546_vm5 = vcmask (!%p363_p2), 1043456   ;;  %vm512_vm6 = vcmask (!%p363_p2), 916480   ;;  %vm503_vm7 = vcmask (!%p363_p2), 924672   ;;  %vm925_vm14 = vmpackc.low (!%p363_p2), %vm1267_vm12, %vm1272_vm13 }
   0x9   : > { %v430_v4 = vsub.s32 (!%p363_p2), 0, %v429_v1  ;;  %v434_v5 = vsub.s32 (!%p363_p2), 1, %v429_v1  ;;  %s1060_s19 = smov (!%p363_p2), 113   ;;  %s1062_s24 = smov (!%p363_p2), 111   ;;  %vm520_vm8 = vcmask (!%p363_p2), 908288   ;;  %vm565_vm9 = vcmask (!%p363_p2), 1041408   ;;  %vm1283_vm15 = vmneg (!%p363_p2), %vm487_vm2 }
   0xa   : > { %vm561_vm10 = vcmask (!%p363_p2), 293888   ;;  %vm631_vm11 = vcmask (!%p363_p2), 31744  }
   0xb   : > { %v1151_v7 = vrot.slane (!%p363_p2), %v421_v2, %v430_v4  ;;  %v1153_v8 = vrot.slane (!%p363_p2), %v421_v2, %v434_v5  ;;  %v1155_v9 = vrot.slane (!%p363_p2), %v422_v3, %v430_v4  ;;  %v1157_v10 = vrot.slane (!%p363_p2), %v422_v3, %v434_v5 }
   0xd   : > { %s1344_s22 = smov (!%p404_p3, %s910_s22), 1  ;;  %v436_v12 = vcombine.low %v1151_v7, %v1153_v8  ;;  %v448_v13 = vcombine.low %v1155_v9, %v1157_v10 }
   0xe   : > { %s943_s27 = sshll.u32 %s1344_s22, 3 }
   0xf   : > { %s408_s30 = scalar_lea.vmem %s1322_s0, %s943_s27 }
  0x10   : > { %v1149_v6 = vld [vmem:[%s408_s30] sm:$0xff] }
  0x11   : > { %v1161_v11 = vcombine.high %v1149_v6, %v1149_v6  ;;  %v438_v15 = vmul.f32 %v436_v12, %v1149_v6  ;;  %v450_v16 = vmul.f32 %v448_v13, %v1149_v6 }
  0x13   : > { %v963_v14 = vpack.i.bf16 %v1161_v11, %v1149_v6  ;;  %v452_v17 = vcombine.high %v438_v15, %v438_v15  ;;  %v473_v18 = vcombine.high %v450_v16, %v450_v16  ;;  %v983_v22 = vpack.i.bf16 %v1149_v6, %v1161_v11 }
  0x15   : > { %964 = vrot.lane.b32.xlu0 %v963_v14, %s1054_s13  ;;  %v973_v19 = vpack.i.bf16 %v452_v17, %v438_v15  ;;  %v978_v20 = vpack.i.bf16 %v473_v18, %v450_v16  ;;  %v988_v21 = vpack.i.bf16 %v450_v16, %v473_v18  ;;  %v993_v23 = vpack.i.bf16 %v438_v15, %v452_v17 }
  0x17   : > { %974 = vrot.lane.b32.xlu1 %v973_v19, %s1055_s14 }
  0x19   : > { %969 = vrot.lane.b32.xlu0 %v973_v19, %s1056_s15 }
  0x1b   : > { %979 = vrot.lane.b32.xlu1 %v978_v20, %s1057_s16 }
  0x1d   : > { %989 = vrot.lane.b32.xlu0 %v988_v21, %s1058_s17 }
  0x1f   : > { %984 = vrot.lane.b32.xlu1 %v983_v22, %s1059_s18 }
  0x21   : > { %994 = vrot.lane.b32.xlu0 %v993_v23, %s1060_s19 }
  0x23   : > { %999 = vrot.lane.b32.xlu1 %v978_v20, %s1062_s24 }
  0x25   : > { %615 = vperm.xlu0 %1003, %v417_v25  }
  0x27   : > { %622 = vperm.xlu1 %1004, %v418_v26  }
  0x87   : > { %v965_v27 = vpop.permute.xlu0 %964 }
  0x88   : > { %v967_v28 = vunpack.i.h.bf16 %v965_v27  ;;  %v966_v29 = vunpack.i.l.bf16 %v965_v27 }
  0x89   : > { %v975_v31 = vpop.permute.xlu1 %974 }
  0x8a   : > { %v471_v30 = vsel %vm468_vm0, 0.0, %v966_v29  ;;  %v469_v33 = vsel %vm468_vm0, %v966_v29, %v967_v28  ;;  %v977_v34 = vunpack.i.h.bf16 %v975_v31  ;;  %v976_v35 = vunpack.i.l.bf16 %v975_v31 }
  0x8b   : > { %v970_v32 = vpop.permute.xlu0 %969  ;;  %v526_v38 = vrot.slane %v471_v30, 4  ;;  %v527_v41 = vrot.slane %v469_v33, 4  ;;  %v630_v33 = vpack.c.bf16 %v1161_v11, %v1161_v11 }
  0x8c   : > { %v972_v36 = vunpack.i.h.bf16 %v970_v32  ;;  %v971_v37 = vunpack.i.l.bf16 %v970_v32  ;;  %v461_v42 = vsel %vm457_vm1, 0.0, %v976_v35  ;;  %v458_v46 = vsel %vm457_vm1, %v976_v35, %v977_v34  ;;  %v415_v35 = vld [vmem:[%s1323_s1] sm:$0xf] }
  0x8d   : > { %v980_v44 = vpop.permute.xlu1 %979  ;;  %v548_v58 = vsel %vm546_vm5, %v458_v46, %v527_v41  ;;  %v547_v60 = vsel %vm546_vm5, %v461_v42, %v526_v38  ;;  %v629_v34 = vpack.c.bf16 %v1149_v6, %v1149_v6 }
  0x8e   : > { %v490_v39 = vsel %vm487_vm2, 0.0, %v971_v37  ;;  %v488_v40 = vsel %vm487_vm2, %v971_v37, %v972_v36  ;;  %v982_v48 = vunpack.i.h.bf16 %v980_v44  ;;  %v981_v49 = vunpack.i.l.bf16 %v980_v44  ;;  %v423_v37 = vld [vmem:[%s1331_s9] sm:$0xf] }
  0x8f   : > { %v531_v43 = vrot.slane %v490_v39, 4  ;;  %v990_v45 = vpop.permute.xlu0 %989  ;;  %v532_v47 = vrot.slane %v488_v40, 4  ;;  %v636_v36 = vsel %vm565_vm9, %v629_v34, 0 }
  0x90   : > { %v992_v50 = vunpack.i.h.bf16 %v990_v45  ;;  %v991_v51 = vunpack.i.l.bf16 %v990_v45  ;;  %v482_v52 = vsel %vm478_vm3, 0.0, %v981_v49  ;;  %v479_v55 = vsel %vm478_vm3, %v981_v49, %v982_v48 }
  0x91   : > { %v985_v56 = vpop.permute.xlu1 %984  ;;  %v550_v59 = vsel %vm546_vm5, %v479_v55, %v532_v47  ;;  %v549_v61 = vsel %vm546_vm5, %v482_v52, %v531_v43  ;;  %v425_v55 = vld [vmem:[%s1333_s11] sm:$0xff] }
  0x92   : > { %v496_v53 = vsel %vm495_vm4, %v992_v50, %v991_v51  ;;  %v498_v54 = vsel %vm495_vm4, %v991_v51, 0.0  ;;  %v987_v62 = vunpack.i.h.bf16 %v985_v56  ;;  %v986_v63 = vunpack.i.l.bf16 %v985_v56 }
  0x93   : > { %v995_v57 = vpop.permute.xlu0 %994  ;;  %v537_v2 = vrot.slane %v496_v53, 4  ;;  %v538_v3 = vrot.slane %v498_v54, 4  ;;  %v556_v4 = vpack.c.bf16 %v550_v59, %v548_v58  ;;  %v555_v5 = vpack.c.bf16 %v549_v61, %v547_v60  ;;  %v420_v53 = vld [vmem:[%s1328_s6] sm:$0xff] }
  0x94   : > { %v997_v0 = vunpack.i.h.bf16 %v995_v57  ;;  %v996_v1 = vunpack.i.l.bf16 %v995_v57  ;;  %v513_v12 = vsel %vm512_vm6, %v987_v62, %v986_v63  ;;  %v515_v13 = vsel %vm512_vm6, %v986_v63, 0.0 }
  0x95   : > { %v542_v16 = vrot.slane %v513_v12, 4  ;;  %v543_v17 = vrot.slane %v515_v13, 4  ;;  %572 = vmatprep.subr.bf16.mxu0 %v556_v4  ;;  %v1000_v18 = vpop.permute.xlu1 %999  ;;  %v552_v21 = vsel %vm546_vm5, %v1161_v11, %v538_v3  ;;  %v551_v23 = vsel %vm546_vm5, %v1149_v6, %v537_v2 }
  0x96   : > { %v504_v14 = vsel %vm503_vm7, %v997_v0, %v996_v1  ;;  %v507_v15 = vsel %vm503_vm7, %v996_v1, 0.0  ;;  %573 = vmatpush1.bf16.msra.mxu0 %v555_v5  ;;  %v1002_v19 = vunpack.i.h.bf16 %v1000_v18  ;;  %v1001_v20 = vunpack.i.l.bf16 %v1000_v18 }
  0x97   : > { %v554_v22 = vsel %vm546_vm5, %v507_v15, %v543_v17  ;;  %v553_v25 = vsel %vm546_vm5, %v504_v14, %v542_v16 }
  0x98   : > { %v524_v26 = vsel %vm520_vm8, %v1002_v19, 0.0  ;;  %v558_v27 = vpack.c.bf16 %v554_v22, %v552_v21  ;;  %v557_v28 = vpack.c.bf16 %v553_v25, %v551_v23  ;;  %v521_v29 = vsel %vm520_vm8, %v1001_v20, %v1002_v19 }
  0x99   : > { %v560_v30 = vpack.c.bf16 %v524_v26, %v524_v26  ;;  %v559_v31 = vpack.c.bf16 %v521_v29, %v521_v29 }
  0x9a   : > { %574 = vmatprep.subr.bf16.mxu0 %v558_v27 }
  0x9b   : > { %575 = vmatpush1.bf16.msra.mxu0 %v557_v28  ;;  %v567_v32 = vsel %vm565_vm9, %v559_v31, 0 }
  0x9c   : > { %919 = vmatprep.subr.msk.bf16.mxu0 %vm565_vm9, %v560_v30 }
  0x9f   : > { %577 = vmatpush1.bf16.msra.mxu0 %v567_v32 }
  0xa0   : > { %921 = vmatprep.subr.msk.bf16.mxu0 %vm565_vm9, %v630_v33  ;;  %vm1288_vm9 = vmneg %vm478_vm3 }
  0xa2   : > { %920 = vmatmul.mubr.msk.bf16.vlgmr.msra.gmra.mrb[0].mxu0 %vm561_vm10, %v415_v35 }
  0xa3   : > { %642 = vmatpush1.bf16.msra.mxu0 %v636_v36  ;;  %673 = vmatprep.mubr.bf16.mxu0 %v1061_v24 }
  0xa4   : > { %v616_v11 = vpop.permute.xlu0 %615 }
  0xa6   : > { %v623_v38 = vpop.permute.xlu1 %622 }
  0xaa   : > { %922 = vmatmul.mubr.msk.bf16.vlgmr.msra.gmra.mrb[4].mxu0 %vm631_vm11, %v423_v37 }
 0x175   : > { %v606_v6 = vpop.f32.mrb[0].mxu0 }
 0x176   : > { %v618_v39 = vmul.f32 %v616_v11, %v606_v6  ;;  %v608_v40 = vpop.f32.mrb[1].mxu0 }
 0x177   : > { %v619_v41 = vmul.f32 %v616_v11, %v608_v40  ;;  %v610_v42 = vpop.f32.mrb[2].mxu0 }
 0x178   : > { %v625_v43 = vadd.f32 %v623_v38, %v618_v39  ;;  %v611_v44 = vpop.f32.mrb[3].mxu0 }
 0x179   : > { %v626_v45 = vadd.f32 %v623_v38, %v619_v41 }
 0x17a   : > { %v1228_v46 = vmax.f32 %v625_v43, 0.0 }
 0x17b   : > { %v1230_v47 = vmax.f32 %v626_v45, 0.0 }
 0x17c   : > { %v698_v24 = vmul.f32 %v1228_v46, %v1151_v7  ;;  %v702_v51 = vmul.f32 %v1228_v46, %v1155_v9  ;;  %v424_v9 = vld [vmem:[%s1332_s10] sm:$0xff] }
 0x17d   : > { %v1005_v48 = vpack.i.bf16 %v1230_v47, %v1228_v46  ;;  %v699_v49 = vmul.f32 %v1230_v47, %v1153_v8  ;;  %v703_v52 = vmul.f32 %v1230_v47, %v1157_v10  ;;  %v419_v8 = vld [vmem:[%s1327_s5] sm:$0xff]  ;;  %v1256_v10 = vpop.f32.mrb[4].mxu0 }
 0x17e   : > { %v1261_v54 = vpop.f32.mrb[5].mxu0 }
 0x17f   : > { %1006 = vrot.lane.b32.xlu0 %v1005_v48, %s1054_s13  ;;  %v1010_v50 = vpack.i.bf16 %v699_v49, %v698_v24  ;;  %v1015_v7 = vpack.i.bf16 %v703_v52, %v702_v51  ;;  %v679_v56 = vpop.f32.mrb[6].mxu0 }
 0x180   : > { %v680_v57 = vpop.f32.mrb[7].mxu0 }
 0x181   : > { %1011 = vrot.lane.b32.xlu1 %v1010_v50, %s1055_s14 }
 0x183   : > { %1021 = vrot.lane.b32.xlu0 %v1010_v50, %s1056_s15 }
 0x185   : > { %1016 = vrot.lane.b32.xlu1 %v1015_v7, %s1057_s16 }
 0x187   : > { %1036 = vrot.lane.b32.xlu0 %v1010_v50, %s1060_s19 }
 0x189   : > { %1026 = vrot.lane.b32.xlu1 %v1015_v7, %s1058_s17 }
 0x18b   : > { %1041 = vrot.lane.b32.xlu0 %v1015_v7, %s1062_s24  ;;  %s944_s24 = sshll.u32 %s1344_s22, 4 }
 0x18c   : > { %s413_s28 = scalar_lea.vmem %s1334_s12, %s944_s24 }
 0x18d   : > { %1031 = vrot.lane.b32.xlu1 %v1005_v48, %s1059_s18 }
 0x18f   : > { %837 = vperm.xlu0 %1003, %v419_v8  }
 0x191   : > { %684 = vperm.xlu1 %1004, %v424_v9  }
 0x193   : > { %844 = vperm.xlu0 %1003, %v420_v53  }
 0x195   : > { %691 = vperm.xlu1 %1004, %v425_v55  }
 0x1f1   : > { %v1007_v58 = vpop.permute.xlu0 %1006 }
 0x1f2   : > { %v1009_v59 = vunpack.i.h.bf16 %v1007_v58  ;;  %v1008_v60 = vunpack.i.l.bf16 %v1007_v58 }
 0x1f3   : > { %v1012_v62 = vpop.permute.xlu1 %1011 }
 0x1f4   : > { %v1014_v0 = vunpack.i.h.bf16 %v1012_v62  ;;  %v1013_v1 = vunpack.i.l.bf16 %v1012_v62  ;;  %v720_v12 = vsel %vm468_vm0, %v1008_v60, %v1009_v59  ;;  %vm930_vm0 = vmpackc.low %vm1283_vm15, %vm1288_vm9 }
 0x1f5   : > { %v1022_v2 = vpop.permute.xlu0 %1021 }
 0x1f6   : > { %v1024_v3 = vunpack.i.h.bf16 %v1022_v2  ;;  %v1023_v4 = vunpack.i.l.bf16 %v1022_v2  ;;  %v710_v5 = vsel %vm457_vm1, %v1013_v1, %v1014_v0  ;;  %v926_v16 = vpack.c.bf16 %v1008_v60, %v1013_v1 }
 0x1f7   : > { %v1017_v13 = vpop.permute.xlu1 %1016  ;;  %v775_v14 = vpack.c.bf16 %v720_v12, %v710_v5  ;;  %vm1063_vm1 = vmmov 1  }
 0x1f8   : > { %v1019_v17 = vunpack.i.h.bf16 %v1017_v13  ;;  %v1018_v18 = vunpack.i.l.bf16 %v1017_v13  ;;  %v738_v22 = vsel %vm487_vm2, %v1023_v4, %v1024_v3  ;;  %vm933_vm10 = vmpackc.low %vm495_vm4, %vm1063_vm1 }
 0x1f9   : > { %v1037_v20 = vpop.permute.xlu0 %1036  ;;  %794 = vmatprep.subr.bf16.mxu1 %v775_v14  ;;  %vm936_vm2 = vmpackc.low %vm512_vm6, %vm503_vm7 }
 0x1fa   : > { %927 = vmatpush1.bf16.msk.msra.mxu1 %vm925_vm14, %v926_v16  ;;  %v730_v21 = vsel %vm478_vm3, %v1018_v18, %v1019_v17  ;;  %v931_v26 = vpack.c.bf16 %v1023_v4, %v1018_v18  ;;  %v1039_v29 = vunpack.i.h.bf16 %v1037_v20  ;;  %v1038_v30 = vunpack.i.l.bf16 %v1037_v20 }
 0x1fb   : > { %v1027_v23 = vpop.permute.xlu1 %1026  ;;  %v777_v25 = vpack.c.bf16 %v738_v22, %v730_v21  ;;  %vm784_vm3 = vcmask 588800  }
 0x1fc   : > { %v1029_v27 = vunpack.i.h.bf16 %v1027_v23  ;;  %v1028_v28 = vunpack.i.l.bf16 %v1027_v23  ;;  %v754_v38 = vsel %vm503_vm7, %v1038_v30, %v1039_v29 }
 0x1fd   : > { %v1042_v31 = vpop.permute.xlu0 %1041  ;;  %796 = vmatprep.subr.bf16.mxu1 %v777_v25 }
 0x1fe   : > { %v934_v32 = vpack.c.bf16 %v1029_v27, %v1230_v47  ;;  %v1044_v33 = vunpack.i.h.bf16 %v1042_v31  ;;  %v1043_v34 = vunpack.i.l.bf16 %v1042_v31  ;;  %932 = vmatpush1.bf16.msk.msra.mxu1 %vm930_vm0, %v931_v26  ;;  %v746_v35 = vsel %vm495_vm4, %v1028_v28, %v1029_v27  ;;  %v416_v47 = vld [vmem:[%s1326_s4] sm:$0xf] }
 0x1ff   : > { %v1032_v36 = vpop.permute.xlu1 %1031  ;;  %v778_v37 = vpack.c.bf16 %v746_v35, %v1228_v46 }
 0x200   : > { %v1034_v11 = vunpack.i.h.bf16 %v1032_v36  ;;  %v1033_v6 = vunpack.i.l.bf16 %v1032_v36  ;;  %935 = vmatprep.subr.msk.bf16.mxu1 %vm933_vm10, %v934_v32  ;;  %v773_v39 = vsel %vm520_vm8, %v1044_v33, 0.0  ;;  %v770_v42 = vsel %vm520_vm8, %v1043_v34, %v1044_v33 }
 0x201   : > { %v783_v44 = vpack.c.bf16 %v773_v39, %v773_v39  ;;  %v782_v45 = vpack.c.bf16 %v770_v42, %v770_v42 }
 0x202   : > { %v937_v40 = vpack.c.bf16 %v1034_v11, %v1039_v29  ;;  %799 = vmatpush1.bf16.msra.mxu1 %v778_v37  ;;  %v762_v41 = vsel %vm512_vm6, %v1033_v6, %v1034_v11 }
 0x203   : > { %v780_v43 = vpack.c.bf16 %v762_v41, %v754_v38  ;;  %v789_v46 = vsel %vm546_vm5, %v782_v45, 0 }
 0x204   : > { %938 = vmatprep.subr.msk.bf16.mxu1 %vm936_vm2, %v937_v40 }
 0x206   : > { %801 = vmatpush1.bf16.msra.mxu1 %v780_v43 }
 0x207   : > { %939 = vmatprep.subr.msk.bf16.mxu1 %vm546_vm5, %v783_v44 }
 0x20a   : > { %803 = vmatpush1.bf16.msra.mxu1 %v789_v46 }
 0x20d   : > { %940 = vmatmul.mubr.msk.bf16.vlgmr.msra.gmra.mrb[0].mxu1 %vm784_vm3, %v416_v47 }
 0x20e   : > { %v838_v48 = vpop.permute.xlu0 %837 }
 0x210   : > { %v685_v24 = vpop.permute.xlu1 %684 }
 0x211   : > { %v687_v51 = vmul.f32 %v685_v24, %v1256_v10  ;;  %v688_v8 = vmul.f32 %v685_v24, %v1261_v54 }
 0x212   : > { %v845_v9 = vpop.permute.xlu0 %844 }
 0x214   : > { %v692_v49 = vpop.permute.xlu1 %691 }
 0x215   : > { %v694_v56 = vadd.f32 %v692_v49, %v687_v51  ;;  %v695_v59 = vadd.f32 %v692_v49, %v688_v8 }
 0x2e0   : > { %v828_v50 = vpop.f32.mrb[0].mxu1 }
 0x2e1   : > { %v840_v52 = vmul.f32 %v838_v48, %v828_v50  ;;  %v830_v7 = vpop.f32.mrb[1].mxu1 }
 0x2e2   : > { %v841_v53 = vmul.f32 %v838_v48, %v830_v7  ;;  %v832_v55 = vpop.f32.mrb[2].mxu1 }
 0x2e3   : > { %v847_v57 = vadd.f32 %v845_v9, %v840_v52  ;;  %v833_v58 = vpop.f32.mrb[3].mxu1 }
 0x2e4   : > { %v848_v60 = vadd.f32 %v845_v9, %v841_v53 }
 0x2e5   : > { %v849_v61 = vadd.f32 %v847_v57, %v694_v56 }
 0x2e6   : > { %v850_v62 = vadd.f32 %v848_v60, %v695_v59 }
 0x2e7   : > { %v851_v10 = vmax.f32 %v849_v61, 0.0 }
 0x2e8   : > { %v852_v63 = vmax.f32 %v850_v62, 0.0 }
 0x2e9   : > { %853 = vst [vmem:[%s413_s28] sm:$0xff] %v851_v10 }
 0x2ea   : > { %854 = vst [vmem:[%s413_s28 + $0x8] sm:$0xff] %v852_v63 }
 0x2eb PF: > { %s22_s21 = sadd.s32 1, %s1052_s21  }
 0x2ec   : > { %p19_p4 = scmp.ge.s32.totalorder %s22_s21, 4  }
 0x2ee   :  { %21 = sbr.rel (!%p19_p4) target bundleno = 1 (0x1), region = 98 }

</bundles_post_ra>
